<compile_context>
chip_gen: v6e
topology: v6e:2x2x1
jax: 0.10.0
libtpu: 0.0.40
codegen_flags: <defaults>
</compile_context>

<pallas_src>
import functools

import jax
import jax.numpy as jnp
from jax.experimental import pallas as pl
from jax.experimental.pallas import tpu as pltpu

_EPS = 1e-5   # BatchNorm2d default eps


# ---------------------------------------------------------------------------
# helpers
# ---------------------------------------------------------------------------
def _vmem_budget_bytes():
    """Generation-aware VMEM budget (v5e/v6e: 128 MiB physical, v7x: 64 MiB)."""
    cap = 64 * 1024 * 1024
    try:
        cap = int(pltpu.get_tpu_info().vmem_capacity_bytes)
    except Exception:
        pass
    return max(16 * 1024 * 1024, min(cap // 2, 96 * 1024 * 1024))


def _pick_lane_tile(l, cin, cout, budget):
    """Largest multiple-of-128 divisor of `l` whose double-buffered blocks fit."""
    assert l % 128 == 0
    t = l
    while t > 128:
        if l % t == 0 and 8 * (cin + cout) * t <= budget // 4:
            return t
        t -= 128
    return 128


def _pick_cblk(mid, hw, budget):
    """Channel-block size for the depthwise kernel: multiple of 8 (or full mid)."""
    for cb in (256, 128, 64, 32, 16, 8):
        if mid % cb == 0 and 16 * cb * hw <= budget // 4:
            return cb
    return mid


def _hard_quant_weight(w, num_bits, clip_val=2.0):
    """HardQuantizeConv weight quantization (value path), hoisted to the wrapper."""
    gamma = (2.0 ** num_bits - 1.0) / (2.0 ** (num_bits - 1))
    sf = gamma * jnp.mean(jnp.abs(w), axis=(1, 2, 3), keepdims=True)   # per out-chan
    scaled = w / sf
    clipped = jnp.clip(scaled, -clip_val / 2.0, clip_val / 2.0)
    n = (2.0 ** num_bits - 1.0) / clip_val
    return sf * (jnp.round((clipped + clip_val / 2.0) * n) / n - clip_val / 2.0)


def _pack_params(scale, offset, alpha, bias, s):
    """Pack per-channel params + LSQ step / reciprocal into one (6, C, 1) tensor."""
    c = scale.shape[0]
    s = s.reshape(())
    rows = [scale.reshape(c, 1), offset.reshape(c, 1),
            alpha.reshape(c, 1), bias.reshape(c, 1),
            jnp.broadcast_to(s.reshape(1, 1), (c, 1)),
            jnp.broadcast_to((1.0 / s).reshape(1, 1), (c, 1))]
    return jnp.stack(rows, axis=0).astype(jnp.float32)


def _shift_lanes(x, off):
    """y[:, i] = x[:, (i + off) % L] for static off (wrapped lanes masked later)."""
    l = x.shape[-1]
    o = off % l
    if o == 0:
        return x
    return jnp.concatenate([x[:, o:], x[:, :o]], axis=1)


# ---------------------------------------------------------------------------
# kernel A (stages 1 & 3): folded prev-BN scale/offset -> PReLU -> bias ->
#   LSQ quant -> 1x1 conv (MXU) + per-step partial BN statistics
# ---------------------------------------------------------------------------
def _pw_stage_kernel(x_ref, p_ref, w_ref, y_ref, sum_ref, sq_ref, *, thd_pos):
    x = x_ref[0].astype(jnp.float32)                         # (cin, TM) lane-dense
    t = x * p_ref[0] + p_ref[1]                              # folded prev-BN + bias
    t = jnp.where(t >= 0.0, t, p_ref[2] * t)                 # PReLU (per-channel)
    t = t + p_ref[3]
    pre = jnp.round(jnp.clip(t * p_ref[5], 0.0, thd_pos)) * p_ref[4]   # LSQ quant
    y = jnp.dot(w_ref[...], pre, preferred_element_type=jnp.float32)   # (cout, TM)
    y_ref[...] = y.astype(y_ref.dtype)
    # per-step partial BN statistics (reduced in the wrapper; keeps grid 'parallel')
    sum_ref[...] = jnp.sum(y, axis=1, keepdims=True)[None, None]
    sq_ref[...] = jnp.sum(y * y, axis=1, keepdims=True)[None, None]


def _pw_stage(x3, p, wq, *, thd_pos, n_img, l_img, tm, x_batched, out_dtype, vmem_limit):
    _, cin, _ = x3.shape
    cout = wq.shape[0]
    n_t = l_img // tm
    grid = (n_img, n_t)

    if x_batched:      # NCHW-style input (N, cin, H*W): transpose folded in here
        x_map = lambda n, i: (n, 0, i)
    else:              # channel-major input (1, cin, N*l_img)
        x_map = lambda n, i: (0, 0, n * n_t + i)

    kernel = functools.partial(_pw_stage_kernel, thd_pos=thd_pos)
    return pl.pallas_call(
        kernel,
        out_shape=(
            jax.ShapeDtypeStruct((cout, n_img * l_img), out_dtype),
            jax.ShapeDtypeStruct((n_img, n_t, cout, 1), jnp.float32),
            jax.ShapeDtypeStruct((n_img, n_t, cout, 1), jnp.float32),
        ),
        grid_spec=pltpu.PrefetchScalarGridSpec(
            num_scalar_prefetch=0,
            grid=grid,
            in_specs=[
                pl.BlockSpec((1, cin, tm), x_map),                    # activations
                pl.BlockSpec((6, cin, 1), lambda n, i: (0, 0, 0)),    # packed params
                pl.BlockSpec((cout, cin), lambda n, i: (0, 0)),       # quant 1x1 W
            ],
            out_specs=[
                pl.BlockSpec((cout, tm), lambda n, i: (0, n * n_t + i)),     # lane-dense out
                pl.BlockSpec((1, 1, cout, 1), lambda n, i: (n, i, 0, 0)),    # partial sum
                pl.BlockSpec((1, 1, cout, 1), lambda n, i: (n, i, 0, 0)),    # partial sumsq
            ],
        ),
        compiler_params=pltpu.CompilerParams(
            dimension_semantics=("parallel", "parallel"),
            vmem_limit_bytes=vmem_limit),
    )(x3, p, wq)


# ---------------------------------------------------------------------------
# kernel B (stage 2): folded BN1 -> bias/PReLU/bias -> LSQ quant ->
#   3x3 depthwise conv (pad=1) as 9 lane-shifted MACs + per-step partial BN stats
# ---------------------------------------------------------------------------
def _dw_stage_kernel(x_ref, p_ref, w_ref, y_ref, sum_ref, sq_ref,
                     *, thd_pos, hdim, wdim, stride):
    x = x_ref[...].astype(jnp.float32)                       # (cb, H*W) lane-dense
    t = x * p_ref[0] + p_ref[1]                              # folded BN1 + bias21
    t = jnp.where(t >= 0.0, t, p_ref[2] * t)
    t = t + p_ref[3]
    pre = jnp.round(jnp.clip(t * p_ref[5], 0.0, thd_pos)) * p_ref[4]

    hw = hdim * wdim
    idx = jax.lax.broadcasted_iota(jnp.int32, (1, hw), 1)
    hi = idx // wdim
    wi = idx - hi * wdim

    # 3x3 depthwise conv (padding=1) as 9 shifted multiply-adds with border masks.
    acc = jnp.zeros_like(pre)
    for kh in range(3):
        dh = kh - 1
        for kw in range(3):
            dw = kw - 1
            shifted = _shift_lanes(pre, dh * wdim + dw)
            valid = ((hi + dh >= 0) & (hi + dh < hdim) &
                     (wi + dw >= 0) & (wi + dw < wdim))
            acc = acc + w_ref[kh * 3 + kw] * jnp.where(valid, shifted, 0.0)
    y_ref[...] = acc.astype(y_ref.dtype)

    # BN2 partial statistics: only stride-selected output positions contribute.
    if stride > 1:
        sel = ((hi % stride) == 0) & ((wi % stride) == 0)
        a1 = jnp.where(sel, acc, 0.0)
        a2 = jnp.where(sel, acc * acc, 0.0)
    else:
        a1, a2 = acc, acc * acc
    sum_ref[...] = jnp.sum(a1, axis=1, keepdims=True)[None]
    sq_ref[...] = jnp.sum(a2, axis=1, keepdims=True)[None]


def _dw_stage(y1, p, wq, *, thd_pos, stride, n_img, hdim, wdim, cb, out_dtype, vmem_limit):
    mid, m0 = y1.shape
    hw = hdim * wdim
    grid = (mid // cb, n_img)
    kernel = functools.partial(_dw_stage_kernel, thd_pos=thd_pos,
                               hdim=hdim, wdim=wdim, stride=stride)
    return pl.pallas_call(
        kernel,
        out_shape=(
            jax.ShapeDtypeStruct((mid, m0), out_dtype),
            jax.ShapeDtypeStruct((n_img, mid, 1), jnp.float32),
            jax.ShapeDtypeStruct((n_img, mid, 1), jnp.float32),
        ),
        grid_spec=pltpu.PrefetchScalarGridSpec(
            num_scalar_prefetch=0,
            grid=grid,
            in_specs=[
                pl.BlockSpec((cb, hw), lambda c, n: (c, n)),          # per-image tile
                pl.BlockSpec((6, cb, 1), lambda c, n: (0, c, 0)),     # packed params
                pl.BlockSpec((9, cb, 1), lambda c, n: (0, c, 0)),     # quant dw weights
            ],
            out_specs=[
                pl.BlockSpec((cb, hw), lambda c, n: (c, n)),          # lane-dense out
                pl.BlockSpec((1, cb, 1), lambda c, n: (n, c, 0)),     # partial sum
                pl.BlockSpec((1, cb, 1), lambda c, n: (n, c, 0)),     # partial sumsq
            ],
        ),
        compiler_params=pltpu.CompilerParams(
            dimension_semantics=("parallel", "parallel"),
            vmem_limit_bytes=vmem_limit),
    )(y1, p, wq)


# ---------------------------------------------------------------------------
# kernel C (stage 4): BN3 normalize (+ residual), NCHW un-transpose folded in
# ---------------------------------------------------------------------------
def _bn3_kernel(y_ref, p_ref, o_ref):
    v = y_ref[...].astype(jnp.float32) * p_ref[0] + p_ref[1]
    o_ref[...] = v[None].astype(o_ref.dtype)


def _bn3_res_kernel(y_ref, p_ref, x_ref, o_ref):
    v = y_ref[...].astype(jnp.float32) * p_ref[0] + p_ref[1] + x_ref[0]
    o_ref[...] = v[None].astype(o_ref.dtype)


def _bn3_stage(y3, p, x_res, *, n_img, l_img, tm, vmem_limit):
    cout, _ = y3.shape
    n_t = l_img // tm
    grid = (n_img, n_t)
    in_specs = [
        pl.BlockSpec((cout, tm), lambda n, i: (0, n * n_t + i)),
        pl.BlockSpec((2, cout, 1), lambda n, i: (0, 0, 0)),
    ]
    args = [y3, p]
    kernel = _bn3_kernel
    if x_res is not None:
        kernel = _bn3_res_kernel
        in_specs.append(pl.BlockSpec((1, cout, tm), lambda n, i: (n, 0, i)))
        args.append(x_res)
    return pl.pallas_call(
        kernel,
        out_shape=jax.ShapeDtypeStruct((n_img, cout, l_img), jnp.float32),
        grid_spec=pltpu.PrefetchScalarGridSpec(
            num_scalar_prefetch=0,
            grid=grid,
            in_specs=in_specs,
            out_specs=pl.BlockSpec((1, cout, tm), lambda n, i: (n, 0, i)),
        ),
        compiler_params=pltpu.CompilerParams(
            dimension_semantics=("parallel", "parallel"),
            vmem_limit_bytes=vmem_limit),
    )(*args)


# ---------------------------------------------------------------------------
# full bottleneck forward
# ---------------------------------------------------------------------------
def bottleneck_forward(x, params, *, stride, wt_bits, ac_bits,
                       interstage_dtype=jnp.float32):
    f32 = jnp.float32
    N, inp, H, W = x.shape
    mid = params["w1"].shape[0]
    oup = params["w3"].shape[0]
    thd = float(2 ** ac_bits - 1)                   # LsqQuan(all_positive=True)
    HW = H * W
    Ho = (H - 1) // stride + 1
    Wo = (W - 1) // stride + 1
    HW2 = Ho * Wo
    M0 = N * HW
    M2 = N * HW2
    if HW % 128 != 0 or HW2 % 128 != 0:
        # TODO(synk): spatial sizes whose H*W isn't a multiple of 128 need lane
        # padding + valid-position masks; not implemented in this lane-dense path.
        raise NotImplementedError("H*W (and Ho*Wo) must be multiples of 128")

    budget = _vmem_budget_bytes()

    # hoisted HardQuantizeConv weight quantization (tiny tensors)
    w1q = _hard_quant_weight(params["w1"].astype(f32), wt_bits).reshape(mid, inp)
    w2q = (_hard_quant_weight(params["w2"].astype(f32), wt_bits)
           .reshape(mid, 9).T.reshape(9, mid, 1))
    w3q = _hard_quant_weight(params["w3"].astype(f32), wt_bits).reshape(oup, mid)

    # ---- stage 1: bias11/PReLU/bias12 -> LSQ -> 1x1 conv (+ BN1 partial stats) ----
    x3 = x.reshape(N, inp, HW).astype(f32)          # free reshape (no transpose)
    p1 = _pack_params(jnp.ones((inp,), f32),
                      params["bias11"].astype(f32),
                      params["prelu1"].astype(f32),
                      params["bias12"].astype(f32),
                      params["s1"].astype(f32))
    tm1 = _pick_lane_tile(HW, inp, mid, budget)
    y1, sum1, sq1 = _pw_stage(x3, p1, w1q, thd_pos=thd, n_img=N, l_img=HW, tm=tm1,
                              x_batched=True, out_dtype=interstage_dtype,
                              vmem_limit=budget)
    mean1 = jnp.sum(sum1, axis=(0, 1)) / M0                        # (mid, 1)
    var1 = jnp.maximum(jnp.sum(sq1, axis=(0, 1)) / M0 - mean1 * mean1, 0.0)
    rstd1 = jax.lax.rsqrt(var1 + _EPS)

    # ---- stage 2: BN1/bias21/PReLU/bias22 -> LSQ -> 3x3 dw conv (+ BN2 stats) ----
    p2 = _pack_params(rstd1,
                      params["bias21"].reshape(mid, 1).astype(f32) - mean1 * rstd1,
                      params["prelu2"].astype(f32),
                      params["bias22"].astype(f32),
                      params["s2"].astype(f32))
    cb = _pick_cblk(mid, HW, budget)
    y2_full, sum2, sq2 = _dw_stage(y1, p2, w2q, thd_pos=thd, stride=stride, n_img=N,
                                   hdim=H, wdim=W, cb=cb, out_dtype=interstage_dtype,
                                   vmem_limit=budget)
    mean2 = jnp.sum(sum2, axis=0) / M2                             # (mid, 1)
    var2 = jnp.maximum(jnp.sum(sq2, axis=0) / M2 - mean2 * mean2, 0.0)
    rstd2 = jax.lax.rsqrt(var2 + _EPS)
    if stride == 1:
        y2 = y2_full
    else:
        # TODO(synk): fold the stride subsampling into kernel 2's out_spec instead
        # of this wrapper-side slice (extra pass over the stage-2 output).
        y2 = y2_full.reshape(mid, N, H, W)[:, :, ::stride, ::stride].reshape(mid, M2)

    # ---- stage 3: BN2/bias31/PReLU/bias32 -> LSQ -> 1x1 conv (+ BN3 stats) ----
    p3 = _pack_params(rstd2,
                      params["bias31"].reshape(mid, 1).astype(f32) - mean2 * rstd2,
                      params["prelu3"].astype(f32),
                      params["bias32"].astype(f32),
                      params["s3"].astype(f32))
    tm3 = _pick_lane_tile(HW2, mid, oup, budget)
    y3, sum3, sq3 = _pw_stage(y2.reshape(1, mid, M2), p3, w3q, thd_pos=thd, n_img=N,
                              l_img=HW2, tm=tm3, x_batched=False,
                              out_dtype=interstage_dtype, vmem_limit=budget)
    mean3 = jnp.sum(sum3, axis=(0, 1)) / M2
    var3 = jnp.maximum(jnp.sum(sq3, axis=(0, 1)) / M2 - mean3 * mean3, 0.0)
    rstd3 = jax.lax.rsqrt(var3 + _EPS)

    # ---- stage 4: BN3 normalize (+ residual), NCHW output written by out_spec ----
    p4 = jnp.stack([rstd3, -mean3 * rstd3], axis=0).astype(f32)    # (2, oup, 1)
    use_res = (inp == oup) and (stride == 1)
    tm4 = _pick_lane_tile(HW2, oup + (inp if use_res else 0), oup, budget)
    out3 = _bn3_stage(y3, p4, x3 if use_res else None, n_img=N, l_img=HW2, tm=tm4,
                      vmem_limit=budget)
    return out3.reshape(N, oup, Ho, Wo)


# ---------------------------------------------------------------------------
# pure-JAX reference (validation only)
# ---------------------------------------------------------------------------
def _reference_forward(x, params, *, stride, wt_bits, ac_bits):
    f32 = jnp.float32
    thd = float(2 ** ac_bits - 1)

    def cvec(v):
        return v.reshape(1, -1, 1, 1).astype(f32)

    def bn(v):
        mean = jnp.mean(v, axis=(0, 2, 3), keepdims=True)
        var = jnp.mean((v - mean) ** 2, axis=(0, 2, 3), keepdims=True)
        return (v - mean) * jax.lax.rsqrt(var + _EPS)

    def block(v, b0, a, b1, s):
        v = v + cvec(b0)
        v = jnp.where(v >= 0.0, v, cvec(a) * v)
        v = v + cvec(b1)
        s = s.reshape(()).astype(f32)
        return jnp.round(jnp.clip(v / s, 0.0, thd)) * s

    dn = ("NCHW", "OIHW", "NCHW")
    hp = jax.lax.Precision.HIGHEST
    w1q = _hard_quant_weight(params["w1"].astype(f32), wt_bits)
    w2q = _hard_quant_weight(params["w2"].astype(f32), wt_bits)
    w3q = _hard_quant_weight(params["w3"].astype(f32), wt_bits)

    out = block(x.astype(f32), params["bias11"], params["prelu1"], params["bias12"], params["s1"])
    out = jax.lax.conv_general_dilated(out, w1q, (1, 1), "VALID",
                                       dimension_numbers=dn, precision=hp)
    out = bn(out)
    out = block(out, params["bias21"], params["prelu2"], params["bias22"], params["s2"])
    out = jax.lax.conv_general_dilated(out, w2q, (stride, stride), ((1, 1), (1, 1)),
                                       dimension_numbers=dn, precision=hp,
                                       feature_group_count=out.shape[1])
    out = bn(out)
    out = block(out, params["bias31"], params["prelu3"], params["bias32"], params["s3"])
    out = jax.lax.conv_general_dilated(out, w3q, (1, 1), "VALID",
                                       dimension_numbers=dn, precision=hp)
    out = bn(out)
    if x.shape[1] == w3q.shape[0] and stride == 1:
        out = out + x
    return out


if __name__ == "__main__":
    key = jax.random.PRNGKey(0)
    kx, kw1, kw2, kw3 = jax.random.split(key, 4)

    # bottleneck(inp=4, oup=4, mid=16, stride=1, wt_bits=4, ac_bits=4)
    N, inp, H, W = 2, 4, 16, 16
    mid, oup = 16, 4
    stride = 1
    wt_bits, ac_bits = 4, 4

    x = jax.random.normal(kx, (N, inp, H, W), dtype=jnp.float32)

    # parameters at module-construction defaults
    params = dict(
        bias11=jnp.zeros((inp,), jnp.float32),
        prelu1=jnp.full((inp,), 0.25, jnp.float32),
        bias12=jnp.zeros((inp,), jnp.float32),
        s1=jnp.ones((1,), jnp.float32),
        w1=(jax.random.uniform(kw1, (mid, inp, 1, 1), dtype=jnp.float32) - 0.5) * 0.001,
        bias21=jnp.zeros((mid,), jnp.float32),
        prelu2=jnp.full((mid,), 0.25, jnp.float32),
        bias22=jnp.zeros((mid,), jnp.float32),
        s2=jnp.ones((1,), jnp.float32),
        w2=(jax.random.uniform(kw2, (mid, 1, 3, 3), dtype=jnp.float32) - 0.5) * 0.001,
        bias31=jnp.zeros((mid,), jnp.float32),
        prelu3=jnp.full((mid,), 0.25, jnp.float32),
        bias32=jnp.zeros((mid,), jnp.float32),
        s3=jnp.ones((1,), jnp.float32),
        w3=(jax.random.uniform(kw3, (oup, mid, 1, 1), dtype=jnp.float32) - 0.5) * 0.001,
    )

    out = bottleneck_forward(x, params, stride=stride, wt_bits=wt_bits, ac_bits=ac_bits)
    out = jax.block_until_ready(out)

    Ho = (H - 1) // stride + 1
    Wo = (W - 1) // stride + 1
    assert out.shape == (N, oup, Ho, Wo), out.shape
    assert bool(jnp.all(jnp.isfinite(out)))

    # structural correctness check vs a pure-JAX reference (mean abs error is robust
    # to isolated round-to-nearest boundary flips from f32 reduction-order noise)
    ref = _reference_forward(x, params, stride=stride, wt_bits=wt_bits, ac_bits=ac_bits)
    mae = float(jnp.mean(jnp.abs(out - ref)))
    assert mae < 3e-2, f"mean |kernel - reference| too large: {mae}"

    print("KERNEL_OK")
</pallas_src>

<mosaic_0001>
module attributes {stable_mosaic.version = 11 : i64} {
  func.func @_pw_stage_kernel(%arg0: i32, %arg1: i32, %arg2: memref<1x4x256xf32, #tpu.memory_space<vmem>>, %arg3: memref<6x4x1xf32, #tpu.memory_space<vmem>>, %arg4: memref<16x4xf32, #tpu.memory_space<vmem>>, %arg5: memref<16x256xf32, #tpu.memory_space<vmem>>, %arg6: memref<1x1x16x1xf32, #tpu.memory_space<vmem>>, %arg7: memref<1x1x16x1xf32, #tpu.memory_space<vmem>>) attributes {dimension_semantics = [#tpu.dimension_semantics<parallel>, #tpu.dimension_semantics<parallel>], iteration_bounds = array<i64: 2, 1>, scalar_prefetch = 0 : i64, scratch_operands = 0 : i64, tpu.core_type = #tpu.core_type<tc>, window_params = [{transform_indices = @transform_0, window_bounds = array<i64: 1, 4, 256>}, {pipeline_mode = #tpu.pipeline_mode<synchronous>, transform_indices = @transform_1, window_bounds = array<i64: 6, 4, 1>}, {pipeline_mode = #tpu.pipeline_mode<synchronous>, transform_indices = @transform_2, window_bounds = array<i64: 16, 4>}, {transform_indices = @transform_3, window_bounds = array<i64: 16, 256>}, {transform_indices = @transform_4, window_bounds = array<i64: 1, 1, 16, 1>}, {transform_indices = @transform_5, window_bounds = array<i64: 1, 1, 16, 1>}]} {
    %c0 = arith.constant 0 : index
    %c0_0 = arith.constant 0 : index
    %c0_1 = arith.constant 0 : index
    %0 = vector.load %arg2[%c0, %c0_0, %c0_1] : memref<1x4x256xf32, #tpu.memory_space<vmem>>, vector<1x4x256xf32>
    %1 = vector.shape_cast %0 : vector<1x4x256xf32> to vector<4x256xf32>
    %c0_2 = arith.constant 0 : index
    %c0_3 = arith.constant 0 : index
    %c0_4 = arith.constant 0 : index
    %2 = vector.load %arg3[%c0_2, %c0_3, %c0_4] : memref<6x4x1xf32, #tpu.memory_space<vmem>>, vector<1x4x1xf32>
    %3 = vector.shape_cast %2 : vector<1x4x1xf32> to vector<4x1xf32>
    %4 = vector.broadcast %3 : vector<4x1xf32> to vector<4x256xf32>
    %5 = arith.mulf %1, %4 : vector<4x256xf32>
    %c1 = arith.constant 1 : index
    %c0_5 = arith.constant 0 : index
    %c0_6 = arith.constant 0 : index
    %6 = vector.load %arg3[%c1, %c0_5, %c0_6] : memref<6x4x1xf32, #tpu.memory_space<vmem>>, vector<1x4x1xf32>
    %7 = vector.shape_cast %6 : vector<1x4x1xf32> to vector<4x1xf32>
    %8 = vector.broadcast %7 : vector<4x1xf32> to vector<4x256xf32>
    %9 = arith.addf %5, %8 : vector<4x256xf32>
    %cst = arith.constant 0.000000e+00 : f32
    %10 = vector.broadcast %cst : f32 to vector<4x256xf32>
    %11 = arith.cmpf oge, %9, %10 : vector<4x256xf32>
    %c2 = arith.constant 2 : index
    %c0_7 = arith.constant 0 : index
    %c0_8 = arith.constant 0 : index
    %12 = vector.load %arg3[%c2, %c0_7, %c0_8] : memref<6x4x1xf32, #tpu.memory_space<vmem>>, vector<1x4x1xf32>
    %13 = vector.shape_cast %12 : vector<1x4x1xf32> to vector<4x1xf32>
    %14 = vector.broadcast %13 : vector<4x1xf32> to vector<4x256xf32>
    %15 = arith.mulf %14, %9 : vector<4x256xf32>
    %16 = arith.select %11, %9, %15 : vector<4x256xi1>, vector<4x256xf32>
    %c3 = arith.constant 3 : index
    %c0_9 = arith.constant 0 : index
    %c0_10 = arith.constant 0 : index
    %17 = vector.load %arg3[%c3, %c0_9, %c0_10] : memref<6x4x1xf32, #tpu.memory_space<vmem>>, vector<1x4x1xf32>
    %18 = vector.shape_cast %17 : vector<1x4x1xf32> to vector<4x1xf32>
    %19 = vector.broadcast %18 : vector<4x1xf32> to vector<4x256xf32>
    %20 = arith.addf %16, %19 : vector<4x256xf32>
    %c5 = arith.constant 5 : index
    %c0_11 = arith.constant 0 : index
    %c0_12 = arith.constant 0 : index
    %21 = vector.load %arg3[%c5, %c0_11, %c0_12] : memref<6x4x1xf32, #tpu.memory_space<vmem>>, vector<1x4x1xf32>
    %22 = vector.shape_cast %21 : vector<1x4x1xf32> to vector<4x1xf32>
    %23 = vector.broadcast %22 : vector<4x1xf32> to vector<4x256xf32>
    %24 = arith.mulf %20, %23 : vector<4x256xf32>
    %cst_13 = arith.constant 0.000000e+00 : f32
    %cst_14 = arith.constant 1.500000e+01 : f32
    %25 = vector.broadcast %cst_13 : f32 to vector<4x256xf32>
    %26 = arith.maximumf %25, %24 : vector<4x256xf32>
    %27 = vector.broadcast %cst_14 : f32 to vector<4x256xf32>
    %28 = arith.minimumf %27, %26 : vector<4x256xf32>
    %29 = math.roundeven %28 : vector<4x256xf32>
    %c4 = arith.constant 4 : index
    %c0_15 = arith.constant 0 : index
    %c0_16 = arith.constant 0 : index
    %30 = vector.load %arg3[%c4, %c0_15, %c0_16] : memref<6x4x1xf32, #tpu.memory_space<vmem>>, vector<1x4x1xf32>
    %31 = vector.shape_cast %30 : vector<1x4x1xf32> to vector<4x1xf32>
    %32 = vector.broadcast %31 : vector<4x1xf32> to vector<4x256xf32>
    %33 = arith.mulf %29, %32 : vector<4x256xf32>
    %c0_17 = arith.constant 0 : index
    %c0_18 = arith.constant 0 : index
    %34 = vector.load %arg4[%c0_17, %c0_18] : memref<16x4xf32, #tpu.memory_space<vmem>>, vector<16x4xf32>
    %cst_19 = arith.constant dense<0.000000e+00> : vector<16x256xf32>
    %35 = tpu.matmul %34, %33, %cst_19 {dimension_numbers = #tpu.dot_dimension_numbers<[1], [0], [0], [1], [0, 0, 1, 1], [], []>} : vector<16x4xf32>, vector<4x256xf32>, vector<16x256xf32> -> vector<16x256xf32>
    %c0_20 = arith.constant 0 : index
    %c0_21 = arith.constant 0 : index
    %36 = vector.load %arg5[%c0_20, %c0_21] : memref<16x256xf32, #tpu.memory_space<vmem>>, vector<16x256xf32>
    tpu.vector_store %arg5[%c0_20, %c0_21], %35 {strides = array<i32>} : memref<16x256xf32, #tpu.memory_space<vmem>>, vector<16x256xf32>,
    %cst_22 = arith.constant dense<0.000000e+00> : vector<16xf32>
    %37 = vector.multi_reduction <add>, %35, %cst_22 [1] : vector<16x256xf32> to vector<16xf32>
    %38 = vector.shape_cast %37 : vector<16xf32> to vector<16x1xf32>
    %39 = vector.shape_cast %38 : vector<16x1xf32> to vector<1x1x16x1xf32>
    %c0_23 = arith.constant 0 : index
    %c0_24 = arith.constant 0 : index
    %c0_25 = arith.constant 0 : index
    %c0_26 = arith.constant 0 : index
    %40 = vector.load %arg6[%c0_23, %c0_24, %c0_25, %c0_26] : memref<1x1x16x1xf32, #tpu.memory_space<vmem>>, vector<1x1x16x1xf32>
    tpu.vector_store %arg6[%c0_23, %c0_24, %c0_25, %c0_26], %39 {strides = array<i32>} : memref<1x1x16x1xf32, #tpu.memory_space<vmem>>, vector<1x1x16x1xf32>,
    %41 = arith.mulf %35, %35 : vector<16x256xf32>
    %cst_27 = arith.constant dense<0.000000e+00> : vector<16xf32>
    %42 = vector.multi_reduction <add>, %41, %cst_27 [1] : vector<16x256xf32> to vector<16xf32>
    %43 = vector.shape_cast %42 : vector<16xf32> to vector<16x1xf32>
    %44 = vector.shape_cast %43 : vector<16x1xf32> to vector<1x1x16x1xf32>
    %c0_28 = arith.constant 0 : index
    %c0_29 = arith.constant 0 : index
    %c0_30 = arith.constant 0 : index
    %c0_31 = arith.constant 0 : index
    %45 = vector.load %arg7[%c0_28, %c0_29, %c0_30, %c0_31] : memref<1x1x16x1xf32, #tpu.memory_space<vmem>>, vector<1x1x16x1xf32>
    tpu.vector_store %arg7[%c0_28, %c0_29, %c0_30, %c0_31], %44 {strides = array<i32>} : memref<1x1x16x1xf32, #tpu.memory_space<vmem>>, vector<1x1x16x1xf32>,
    return
  }
  func.func @transform_0(%arg0: i32, %arg1: i32) -> (i32, i32, i32) {
    %c0_i32 = arith.constant 0 : i32
    %c0_i32_0 = arith.constant 0 : i32
    return %arg0, %c0_i32, %arg1 : i32, i32, i32
  }
  func.func @transform_1(%arg0: i32, %arg1: i32) -> (i32, i32, i32) {
    %c0_i32 = arith.constant 0 : i32
    %c0_i32_0 = arith.constant 0 : i32
    %c0_i32_1 = arith.constant 0 : i32
    %c0_i32_2 = arith.constant 0 : i32
    return %c0_i32, %c0_i32_0, %c0_i32_1 : i32, i32, i32
  }
  func.func @transform_2(%arg0: i32, %arg1: i32) -> (i32, i32) {
    %c0_i32 = arith.constant 0 : i32
    %c0_i32_0 = arith.constant 0 : i32
    %c0_i32_1 = arith.constant 0 : i32
    return %c0_i32, %c0_i32_0 : i32, i32
  }
  func.func @transform_3(%arg0: i32, %arg1: i32) -> (i32, i32) {
    %c1_i32 = arith.constant 1 : i32
    %0 = arith.muli %arg0, %c1_i32 : i32
    %1 = arith.addi %0, %arg1 : i32
    %c0_i32 = arith.constant 0 : i32
    %c0_i32_0 = arith.constant 0 : i32
    return %c0_i32, %1 : i32, i32
  }
  func.func @transform_4(%arg0: i32, %arg1: i32) -> (i32, i32, i32, i32) {
    %c0_i32 = arith.constant 0 : i32
    %c0_i32_0 = arith.constant 0 : i32
    %c0_i32_1 = arith.constant 0 : i32
    return %arg0, %arg1, %c0_i32, %c0_i32_0 : i32, i32, i32, i32
  }
  func.func @transform_5(%arg0: i32, %arg1: i32) -> (i32, i32, i32, i32) {
    %c0_i32 = arith.constant 0 : i32
    %c0_i32_0 = arith.constant 0 : i32
    %c0_i32_1 = arith.constant 0 : i32
    return %arg0, %arg1, %c0_i32, %c0_i32_0 : i32, i32, i32, i32
  }
}

</mosaic_0001>

<bundles_post_ra>
// kernel: tpu_custom_call.1
= control target key start
LH: loop header
LB: loop body
LE: loop exit
PB: predicated region body
PF: predicated region fallthrough
CT: control target
= control target key end

     0   :  { %11 = vsyncpa [#allocation3], 0  ;;  %s1078_s0 = inlined_call_operand.vmem [shape: f32[2,4,256], index: 0, kind: input, shape index: {}]   ;;  %s1079_s1 = inlined_call_operand.vmem [shape: f32[6,4,1], index: 1, kind: input, shape index: {}]   ;;  %s1080_s2 = inlined_call_operand.vmem [shape: f32[16,4], index: 2, kind: input, shape index: {}]   ;;  %s1081_s3 = inlined_call_operand.hbm [shape: f32[16,512], index: 3, kind: output, shape index: {0}]   ;;  %s1082_s4 = inlined_call_operand.vmem [shape: f32[2,1,16,1], index: 4, kind: output, shape index: {1}]   ;;  %s1083_s5 = inlined_call_operand.vmem [shape: f32[2,1,16,1], index: 5, kind: output, shape index: {2}]  }
   0x1   :  { %13 = vsyncpa [#allocation3 + $0x1], 0  ;;  %s930_s18 = smov 0   ;;  %s932_s19 = smov 0  }
   0x2   :  { %s934_s20 = smov 0   ;;  %s936_s21 = smov 0  }
   0x3   :  { %s938_s22 = smov 0   ;;  %s940_s23 = smov 0  }
   0x4 LB: > { %s712_s24 = sadd.s32 4294967295, %s891_s23   ;;  %s713_s25 = sadd.s32 4294967294, %s891_s23   ;;  %s891_s23 = sphi %s940_s23, %s19_s23   ;;  %s887_s22 = sphi %s938_s22, %s1090_s22   ;;  %s883_s21 = sphi %s936_s21, %s1089_s21   ;;  %s879_s20 = sphi %s934_s20, %s1088_s20   ;;  %s875_s19 = sphi %s932_s19, %s1087_s19   ;;  %s871_s18 = sphi %s930_s18, %s1086_s18  }
   0x5   : > { %s31_s26 = sadd.s32 1, %s887_s22  ;;  %s110_s27 = sadd.s32 1, %s879_s20 }
   0x6   : > { %p33_p0 = scmp.ge.s32.totalorder %s31_s26, 2  ;;  %p120_p1 = scmp.ne.s32.totalorder %s879_s20, %s875_s19 }
   0x7   : > { %p121_p2 = scmp.eq.s32.totalorder %s712_s24, 1  ;;  %p126_p3 = scmp.ne.s32.totalorder %s875_s19, %s871_s18 }
   0x8   : > { %s1092_s26 = smov (%p33_p0, %s31_s26), 0  ;;  %p127_p5 = scmp.eq.s32.totalorder %s713_s25, 1 }
   0x9   : > { %p970_p4 = por %p121_p2, %p120_p1  ;;  %s107_s29 = ssub.s32 %s887_s22, %s1092_s26 }
   0xa   : > { %p716_p6 = scmp.ge.s32.totalorder %s891_s23, 1  ;;  %p108_p7 = scmp.eq.s32.totalorder %s107_s29, 0 }
   0xb   : > { %p977_p8 = por %p127_p5, %p126_p3  ;;  %p220_p9 = scmp.lt.s32.totalorder %s891_s23, 3 }
   0xc   : > { %s983_s6 = scalar_select %p108_p7, %s879_s20, %s110_s27  }
   0xd   : > { %p221_p10 = pnand %p716_p6, %p220_p9 }
   0xe   : > { %p271_p11 = scmp.lt.s32.totalorder (!%p221_p10), %s883_s21, 1  ;;  %s245_s13 = sand.u32 (!%p221_p10), 1, %s875_s19  }
   0xf   : > { %224 = sbr.rel (%p221_p10) target bundleno = 528 (0x210), region = 32  ;;  %s717_s14 = sshll.u32 (!%p221_p10), %s245_s13, 5 }
  0x10   : > { %s247_s15 = scalar_lea.vmem (!%p221_p10), [#allocation2], %s717_s14  ;;  %s741_s17 = sshll.u32 (!%p221_p10), %s883_s21, 8 }
  0x11   : > { %s547_s16 = sshll.u32 (!%p221_p10), %s247_s15, 4  ;;  %s1024_s29 = scalar_lea.hbm (!%p221_p10), %s1081_s3, %s741_s17  ;;  %s1018_s16 = int_to_ptr.vmem [resolvable:$true] %s547_s16 }
  0x12   : > { %s1026_s7 = scalar_lea.sflag (!%p221_p10), [#allocation3], %s245_s13  ;;  %s896_s9 = smov (!%p221_p10), [#allocation2]  }
  0x13   : > { %s819_s10 = sshll.u32 (!%p221_p10), %s896_s9, 4  ;;  %s820_s10 = int_to_ptr.vmem [resolvable:$false] %s819_s10 }
  0x14   : > { %v301_v0 = vld [vmem:[%s1079_s1] sm:$0xf]  ;;  %v725_v1 = vld [vmem:[%s1079_s1 + $0x8] sm:$0xf]  ;;  %v893_v2 = vmov 0   ;;  %v894_v7 = vmov 0.0   ;;  %v309_v10 = vlaneseq  ;;  %p822_p1 = scmp.lt.s32.totalorder %s1018_s16, %s820_s10 }
  0x15   : > { %813 = vset.pattern.permute.xlu0 %v893_v2  ;;  %814 = vset.pattern.permute.xlu1 %v893_v2  ;;  %v724_v3 = vld [vmem:[%s1079_s1 + $0x4] sm:$0xf]  ;;  %v726_v4 = vld [vmem:[%s1079_s1 + $0xc] sm:$0xf]  ;;  %v727_v5 = vld [vmem:[%s1079_s1 + $0x14] sm:$0xf] }
  0x16   : > { %304 = vperm.xlu0 %813, %v301_v0   ;;  %335 = vperm.xlu1 %814, %v725_v1   ;;  %v728_v6 = vld [vmem:[%s1079_s1 + $0x10] sm:$0xf]  ;;  %v895_v8 = vmov 839922192   ;;  %s1005_s25 = scalar_select %p271_p11, %s883_s21, 1  ;;  %v310_v12 = vshrl.u32 %v309_v10, 7 }
  0x17   : > { %476 = vmatprep.mubr.f32.mxu0 %v894_v7  ;;  %482 = vmatprep.mubr.f32.mxu1 %v894_v7  ;;  %v307_v9 = vunpack.c.l.s4 %v895_v8  ;;  %vm407_vm2 = vcmask 1043456   ;;  %v396_v46 = vld [vmem:[%s1080_s2] sm:$0xff]  ;;  %vm400_vm3 = vcmask 31744   ;;  %v397_v47 = vld [vmem:[%s1080_s2 + $0x8] sm:$0xff]  ;;  %s821_s11 = scalar_lea.vmem %s820_s10, 1024 }
  0x18   : > { %s738_s27 = sshll.u32 %s1005_s25, 3 }
  0x19   : > { %v308_v11 = vunpack.c.0.s8 %v307_v9  ;;  %s278_s8 = scalar_lea.vmem %s1078_s0, %s738_s27 }
  0x1a   : > { %319 = vperm.xlu0 %813, %v724_v3   ;;  %352 = vperm.xlu1 %814, %v726_v4   ;;  %v300_v16 = vld [vmem:[%s278_s8] sm:$0xff]  ;;  %s815_s8 = scalar_lea.vmem %s1018_s16, 512 }
  0x1b   : > { %v311_v13 = vsub.s32 %v308_v11, %v310_v12  ;;  %p816_p12 = scmp.ne.s32.totalorder %s1018_s16, %s815_s8  ;;  %p823_p2 = scmp.lt.s32.totalorder %s821_s11, %s815_s8 }
  0x1d   : > { %p817_p13 = pnand %p816_p12, %p970_p4  ;;  %p824_p3 = por %p823_p2, %p822_p1 }
  0x1e   : > { %367 = vperm.xlu0 %813, %v727_v5   ;;  %385 = vperm.xlu1 %814, %v728_v6  }
  0x1f   : > { %p818_p0 = pneg %p817_p13 }
  0x21   : > { %p825_p5 = pnand %p824_p3, %p818_p0 }
  0x91   : > { %v305_v14 = vpop.permute.xlu0 %304  ;;  %v336_v20 = vpop.permute.xlu1 %335 }
  0x92   : > { %v312_v15 = vrot.slane %v305_v14, %v311_v13 }
  0x94   : > { %v314_v18 = vmul.f32 %v312_v15, %v300_v16 }
  0x95   : > { %v320_v17 = vpop.permute.xlu0 %319  ;;  %v353_v25 = vpop.permute.xlu1 %352 }
  0x96   : > { %v327_v19 = vrot.slane %v320_v17, %v311_v13  ;;  %v360_v28 = vrot.slane %v353_v25, %v311_v13 }
  0x98   : > { %v329_v21 = vadd.f32 %v327_v19, %v314_v18 }
  0x99   : > { %v368_v27 = vpop.permute.xlu0 %367  ;;  %v386_v38 = vpop.permute.xlu1 %385 }
  0x9a   : > { %v339_v22 = vcombine.high %v329_v21, %v329_v21  ;;  %v341_v23 = vmul.f32 %v336_v20, %v329_v21  ;;  %vm330_vm0 = vcmp.ge.f32.partialorder %v329_v21, 0.0  ;;  %v375_v31 = vrot.slane %v368_v27, %v311_v13 }
  0x9b   : > { %v393_v42 = vrot.slane %v386_v38, %v311_v13 }
  0x9c   : > { %v342_v24 = vmul.f32 %v339_v22, %v336_v20 }
  0x9e   : > { %v345_v26 = vcombine.low %v341_v23, %v342_v24 }
  0xa0   : > { %v347_v29 = vsel %vm330_vm0, %v329_v21, %v345_v26 }
  0xa1   : > { %v362_v30 = vadd.f32 %v360_v28, %v347_v29 }
  0xa3   : > { %v377_v32 = vmul.f32 %v375_v31, %v362_v30 }
  0xa5   : > { %v378_v33 = vmax.f32 %v377_v32, 0.0 }
  0xa7   : > { %v379_v34 = vmin.f32 %v378_v33, 15.0 }
  0xa9   : > { %v746_v35 = vcvt.f32.s32 %v379_v34  ;;  %v744_v37 = vand.u32 2147483647, %v379_v34  ;;  %v749_v40 = vand.u32 2147483648, %v379_v34 }
  0xab   : > { %v747_v36 = vcvt.s32.f32 %v746_v35  ;;  %vm745_vm1 = vcmp.lt.f32.partialorder %v744_v37, 8388608.0 }
  0xad   : > { %v748_v39 = vand.u32 2147483647, %v747_v36 }
  0xaf   : > { %v750_v41 = vor.u32 %v749_v40, %v748_v39 }
  0xb1   : > { %v751_v43 = vsel %vm745_vm1, %v750_v41, %v379_v34 }
  0xb2   : > { %v395_v44 = vmul.f32 %v751_v43, %v393_v42 }
  0xb4   : > { %v399_v45 = vcombine.high %v395_v44, %v395_v44 }
  0xb6   : > { %729 = vmatprep.subr.msk.mxu0 %vm407_vm2, %v399_v45  ;;  %742 = vmatprep.subr.msk.mxu1 %vm407_vm2, %v399_v45 }
  0xb7   : > { %730 = vmatpush1.msk.msra.mxu0 %vm407_vm2, %v395_v44  ;;  %743 = vmatpush1.msk.msra.mxu1 %vm407_vm2, %v395_v44 }
  0xb8   : > { %731 = vmatmul.mubr.msk.f32.vlgmr.msra.gmra.mxu0 %vm400_vm3, %v396_v46  ;;  %732 = vmatmul.mubr.msk.f32.vlgmr.msra.gmra.mxu1 %vm400_vm3, %v397_v47 }
 0x178   : > { %v478_v48 = vpop.f32.mrf.mxu0  ;;  %v484_v49 = vpop.f32.mrf.mxu1 }
 0x179   : > { %489 = vst [vmem:[%s247_s15] sm:$0xff] %v478_v48  ;;  %491 = vst [vmem:[%s247_s15 + $0x10] sm:$0xff] %v484_v49  ;;  %v502_v55 = vmul.f32 %v478_v48, %v478_v48  ;;  %v504_v58 = vmul.f32 %v484_v49, %v484_v49 }
 0x17a   : > { %v480_v50 = vpop.f32.mrf.mxu0  ;;  %v486_v51 = vpop.f32.mrf.mxu1 }
 0x17b   : > { %490 = vst [vmem:[%s247_s15 + $0x8] sm:$0xff] %v480_v50  ;;  %v503_v52 = vmul.f32 %v480_v50, %v480_v50  ;;  %v493_v53 = vadd.f32 %v480_v50, %v478_v48  ;;  %492 = vst [vmem:[%s247_s15 + $0x18] sm:$0xff] %v486_v51  ;;  %v496_v54 = vadd.f32 %v486_v51, %v484_v49 }
 0x17c   : > { %v505_v56 = vmul.f32 %v486_v51, %v486_v51 }
 0x17d   : > { %494 = vadd.xlane.f32.xlu0 %v493_v53  ;;  %497 = vadd.xlane.f32.xlu1 %v496_v54  ;;  %v506_v57 = vadd.f32 %v503_v52, %v502_v55 }
 0x17e   : > { %v509_v59 = vadd.f32 %v505_v56, %v504_v58 }
 0x181   : > { %507 = vadd.xlane.f32.xlu0 %v506_v57 }
 0x185   : > { %510 = vadd.xlane.f32.xlu0 %v509_v59 }
 0x186   : > { %828 = shalt.err (!%p825_p5)
}
 0x187   : > { %s829_s21 = scalar_lea.hbm %s1024_s29, 512  ;;  %s833_s14 = scalar_lea.hbm %s1081_s3, 1024 }
 0x188   : > { %p830_p6 = scmp.ne.s32.totalorder %s1024_s29, %s829_s21  ;;  %p834_p10 = scmp.lt.s32.totalorder %s1024_s29, %s1081_s3 }
 0x189   : > { %p835_p11 = scmp.lt.s32.totalorder %s833_s14, %s829_s21 }
 0x18a   : > { %p831_p7 = pnand %p830_p6, %p970_p4 }
 0x18b   : > { %p836_p12 = por %p835_p11, %p834_p10 }
 0x18c   : > { %p832_p9 = pneg %p831_p7 }
 0x18e   : > { %p837_p13 = pnand %p836_p12, %p832_p9 }
 0x190   : > { %840 = shalt.err (!%p837_p13)
}
 0x191   : > { %s897_s24 = smov 256   ;;  %s898_s27 = smov 512   ;;  %vm499_vm4 = vcmask 7168  }
 0x192   : > { %s899_s8 = smov 16   ;;  %s739_s9 = sshll.u32 %s1005_s25, 4 }
 0x193   : > { %752 = dma.vmem_to_hbm [thread:$0]  (%p970_p4), %s1018_s16, 512, %s1024_s29, %s1026_s7, %s897_s24, %s898_s27, %s899_s8  }
 0x194   : > { %s290_s12 = scalar_lea.vmem %s1082_s4, %s739_s9  ;;  %s299_s14 = scalar_lea.vmem %s1083_s5, %s739_s9 }
 0x206   : > { %v495_v60 = vpop.xlane.xlu0 %494  ;;  %v498_v61 = vpop.xlane.xlu1 %497 }
 0x207   : > { %500 = vst.msk [vmem:[%s290_s12] sm:$0xff] %vm499_vm4, %v495_v60  ;;  %501 = vst.msk [vmem:[%s290_s12 + $0x8] sm:$0xff] %vm499_vm4, %v498_v61 }
 0x20a   : > { %v508_v62 = vpop.xlane.xlu0 %507 }
 0x20b   : > { %512 = vst.msk [vmem:[%s299_s14] sm:$0xff] %vm499_vm4, %v508_v62 }
 0x20e   : > { %v511_v63 = vpop.xlane.xlu0 %510 }
 0x20f   : > { %513 = vst.msk [vmem:[%s299_s14 + $0x8] sm:$0xff] %vm499_vm4, %v511_v63 }
 0x210 PF: > { %p758_p4 = scmp.ge.s32.totalorder %s891_s23, 2  ;;  %s568_s28 = sand.u32 1, %s871_s18  }
 0x211   : > { %s569_s25 = scalar_lea.sflag [#allocation3], %s568_s28 }
 0x212   : > { %p755_p0 = pnand %p758_p4, %p977_p8 }
 0x214   : > { %p756_p1 = pneg %p755_p0 }
 0x216   : > { %866 = dma.done.wait (%p756_p1), %s569_s25, 512  }
 0x217   : > { %868 = vsyncadd (%p756_p1), %s569_s25, 4294966784  ;;  %s19_s23 = sadd.s32 1, %s891_s23   ;;  %s1086_s18 = smov %s875_s19 }
 0x218   : > { %p16_p2 = scmp.ge.s32.totalorder %s19_s23, 4   ;;  %s1087_s19 = smov %s879_s20 }
 0x219   : > { %s1088_s20 = smov %s983_s6  ;;  %s1089_s21 = smov %s887_s22 }
 0x21a   : > { %s1090_s22 = smov %s1092_s26  ;;  %18 = sbr.rel (!%p16_p2) target bundleno = 4 (0x4), region = 96 }
 0x21f   :  { %598 = vsyncpa [#allocation3], 1 }
 0x220   :  { %600 = vsyncpa [#allocation3 + $0x1], 1 }

</bundles_post_ra>
